<compile_context>
chip_gen: v7x
topology: tpu7x:2x2x1
jax: 0.10.0
libtpu: 0.0.40
codegen_flags: <defaults>
</compile_context>

<pallas_src>
import functools

import jax
import jax.numpy as jnp
from jax.experimental import pallas as pl
from jax.experimental.pallas import tpu as pltpu

BN_EPS = 1e-5  # torch.nn.BatchNorm default eps


def _stage2_wrapper_kernel(x_ref, w_ref, b_ref, zs_ref, pred_ref):
    # x_ref: (Cin, tn) channel-major token tile; tn is a multiple of 128 so every
    # load/store is lane-dense (no masked vst.msk partial stores).
    # w_ref: (2*Cz, Cin) fused [encoder+BN ; prediction-head] weights (folded at
    # trace time); b_ref: (2*Cz, 1) fused biases.
    cz = zs_ref.shape[0]
    r = jnp.dot(w_ref[...], x_ref[...],
                preferred_element_type=jnp.float32) + b_ref[...]
    zs_ref[...] = r[:cz].astype(zs_ref.dtype)      # normalized latent (Stage1Encodings.zs)
    pred_ref[...] = r[cz:].astype(pred_ref.dtype)  # stage-2 prediction (zs_pred)


def _round_up(x, m):
    return ((x + m - 1) // m) * m


def _pick_token_tile(hw_p, batch, cin, cz_p, *, vmem_budget=24 * 1024 * 1024,
                     n_buffers=3):
    """Largest 128-multiple divisor of hw_p fitting the VMEM budget, preferring
    >= 8 even total grid steps (>= 4 per TensorCore on v7x megacore)."""
    per_token_bytes = 4 * (cin + 2 * cz_p)             # x tile + two output tiles (f32)
    cap = max(128, (vmem_budget // (per_token_bytes * n_buffers)) // 128 * 128)
    cap = min(cap, hw_p)
    candidates = [t for t in range(128, cap + 1, 128) if hw_p % t == 0]
    if not candidates:                                  # hw_p is a multiple of 128, so 128 always works
        candidates = [128]

    def steps(t):
        return batch * (hw_p // t)

    for ok in (lambda t: steps(t) >= 8 and steps(t) % 2 == 0,   # pipelined + both TCs busy
               lambda t: steps(t) >= 2,                          # at least some overlap
               lambda t: True):
        good = [t for t in candidates if ok(t)]
        if good:
            return max(good)
    return candidates[-1]


def _spec(block_shape, index_map, n_buf=None):
    """BlockSpec, with deeper pipelining when supported by this jax version."""
    if n_buf is not None and n_buf > 2 and hasattr(pl, "Buffered"):
        try:
            return pl.BlockSpec(block_shape, index_map,
                                pipeline_mode=pl.Buffered(n_buf))
        except TypeError:
            pass
    return pl.BlockSpec(block_shape, index_map)


@functools.partial(jax.jit, static_argnames=("out_dtype",))
def stage2_wrapper_forward(x_nchw, params, out_dtype=jnp.float32):
    """x_nchw: [B, Cin, H, W] float32.  Returns (zs, zs_pred, zs_degraded) in NCHW.

    out_dtype=jnp.bfloat16 halves output HBM traffic (~94% of total bytes here)
    if the consumer tolerates bf16 latents; default f32 preserves exact module
    semantics.
    """
    B, Cin, H, W = x_nchw.shape
    Cz = params["w_enc"].shape[1]
    HW = H * W

    # ---- pad to lane/sublane-dense shapes (sliced off after the kernel) ----
    HW_p = _round_up(HW, 128)   # token (lane) dim
    Cz_p = _round_up(Cz, 8)     # channel (sublane) dim of the outputs

    # Free reshape: NCHW is already channel-major with tokens contiguous last.
    x = x_nchw.reshape(B, Cin, HW)
    if HW_p != HW:
        x = jnp.pad(x, ((0, 0), (0, 0), (0, HW_p - HW)))

    # ---- trace-time folding (tiny, weight-sized work) ----
    inv_std = jax.lax.rsqrt(params["running_var"] + BN_EPS)            # (Cz,)
    w_enc_f = params["w_enc"] * inv_std[None, :]                       # (Cin, Cz)
    b_enc_f = (params["b_enc"] - params["running_mean"]) * inv_std     # (Cz,)
    w_pred = w_enc_f @ params["w2"]                                    # (Cin, Cz)
    b_pred = b_enc_f @ params["w2"] + params["b2"]                     # (Cz,)

    def pad_cz(a):  # pad the trailing Cz axis up to Cz_p with zeros
        if Cz_p == Cz:
            return a
        return jnp.pad(a, [(0, 0)] * (a.ndim - 1) + [(0, Cz_p - Cz)])

    we_t = pad_cz(w_enc_f).T                    # (Cz_p, Cin)   zs^T   = we_t @ x + be
    wp_t = pad_cz(w_pred).T                     # (Cz_p, Cin)   pred^T = wp_t @ x + bp
    w_fused = jnp.concatenate([we_t, wp_t], axis=0)                    # (2*Cz_p, Cin)
    b_fused = jnp.concatenate([pad_cz(b_enc_f), pad_cz(b_pred)],
                              axis=0).reshape(2 * Cz_p, 1)             # (2*Cz_p, 1)

    # ---- tiling / pipelining decisions ----
    tn = _pick_token_tile(HW_p, B, Cin, Cz_p)
    steps = B * (HW_p // tn)
    n_buf = max(2, min(3, steps))               # 3-deep only when there are >= 3 steps

    grid = (B, HW_p // tn)
    x_spec = _spec((None, Cin, tn), lambda b, j: (b, 0, j), n_buf)
    out_spec = _spec((None, Cz_p, tn), lambda b, j: (b, 0, j), n_buf)
    w_spec = pl.BlockSpec((2 * Cz_p, Cin), lambda b, j: (0, 0))
    b_spec = pl.BlockSpec((2 * Cz_p, 1), lambda b, j: (0, 0))

    out_itemsize = jnp.dtype(out_dtype).itemsize
    flops = 2 * B * HW_p * Cin * (2 * Cz_p)
    bytes_accessed = (4 * B * Cin * HW_p                       # x read
                      + out_itemsize * 2 * B * Cz_p * HW_p     # two output writes
                      + 4 * (2 * Cz_p * Cin + 2 * Cz_p))       # weights/bias

    zs_cm, pred_cm = pl.pallas_call(
        _stage2_wrapper_kernel,
        out_shape=(
            jax.ShapeDtypeStruct((B, Cz_p, HW_p), out_dtype),
            jax.ShapeDtypeStruct((B, Cz_p, HW_p), out_dtype),
        ),
        grid_spec=pltpu.PrefetchScalarGridSpec(
            num_scalar_prefetch=0,
            grid=grid,
            in_specs=[
                x_spec,    # x tokens, channel-major tile (Cin, tn)
                w_spec,    # fused folded weights (2*Cz_p, Cin)
                b_spec,    # fused folded biases  (2*Cz_p, 1)
            ],
            out_specs=[out_spec, out_spec],
        ),
        compiler_params=pltpu.CompilerParams(
            dimension_semantics=("parallel", "parallel"),
            vmem_limit_bytes=48 * 1024 * 1024),   # guardrail: fits v7x's 64 MiB VMEM
        cost_estimate=pl.CostEstimate(
            flops=flops, transcendentals=0, bytes_accessed=bytes_accessed),
    )(x, w_fused, b_fused)

    # Slice off padding; reshapes back to NCHW are free.
    zs = zs_cm[:, :Cz, :HW].reshape(B, Cz, H, W)         # Stage1Encodings.zs (normalized)
    zs_pred = pred_cm[:, :Cz, :HW].reshape(B, Cz, H, W)  # Stage2ModelOutput.zs_pred
    zs_degraded = zs                                     # Stage2ModelOutput.zs_degraded (identity)
    return zs, zs_pred, zs_degraded


def _reference(x_nchw, params):
    """Un-folded reference matching the PyTorch module's math exactly."""
    B, Cin, H, W = x_nchw.shape
    Cz = params["w_enc"].shape[1]
    x_tok = jnp.transpose(x_nchw, (0, 2, 3, 1)).reshape(-1, Cin)
    z = x_tok @ params["w_enc"] + params["b_enc"]
    zn = (z - params["running_mean"]) / jnp.sqrt(params["running_var"] + BN_EPS)
    pred = zn @ params["w2"] + params["b2"]
    to_nchw = lambda t: jnp.transpose(t.reshape(B, H, W, Cz), (0, 3, 1, 2))
    return to_nchw(zn), to_nchw(pred)


if __name__ == "__main__":
    key = jax.random.PRNGKey(0)
    B, Cin, H, W, Cz = 2, 4, 16, 16, 32

    k = jax.random.split(key, 8)
    x = jax.random.normal(k[0], (B, Cin, H, W), jnp.float32)
    params = {
        "w_enc": jax.random.normal(k[1], (Cin, Cz), jnp.float32) * 0.1,
        "b_enc": jax.random.normal(k[2], (Cz,), jnp.float32) * 0.01,
        "running_mean": jax.random.normal(k[3], (Cz,), jnp.float32) * 0.05,
        "running_var": jax.nn.softplus(jax.random.normal(k[4], (Cz,), jnp.float32)) + 0.5,
        "w2": jax.random.normal(k[5], (Cz, Cz), jnp.float32) * 0.1,
        "b2": jax.random.normal(k[6], (Cz,), jnp.float32) * 0.01,
    }

    zs, zs_pred, zs_degraded = jax.block_until_ready(
        stage2_wrapper_forward(x, params))

    zs_ref, pred_ref = _reference(x, params)
    assert jnp.allclose(zs, zs_ref, atol=1e-4, rtol=1e-4)
    assert jnp.allclose(zs_pred, pred_ref, atol=1e-4, rtol=1e-4)
    assert jnp.allclose(zs_degraded, zs_ref, atol=1e-4, rtol=1e-4)
    assert zs.shape == (B, Cz, H, W) and zs_pred.shape == (B, Cz, H, W)

    # TODO(synk): compute_loss / infer / decode paths of the wrapper are not part of
    # forward() and are left to the (abstract) stage-2 model; not implemented here.
    # TODO(synk): on v5e, casting the dot operands to bf16 (keeping f32 accumulate)
    # would skip the multi-pass f32 MXU path; left out to preserve exact f32 numerics.
    print("KERNEL_OK")
</pallas_src>

<mosaic_0001>
module attributes {stable_mosaic.version = 11 : i64} {
  func.func @_stage2_wrapper_kernel(%arg0: i32, %arg1: i32, %arg2: memref<1x4x256xf32, #tpu.memory_space<vmem>>, %arg3: memref<64x4xf32, #tpu.memory_space<vmem>>, %arg4: memref<64x1xf32, #tpu.memory_space<vmem>>, %arg5: memref<1x32x256xf32, #tpu.memory_space<vmem>>, %arg6: memref<1x32x256xf32, #tpu.memory_space<vmem>>) attributes {dimension_semantics = [#tpu.dimension_semantics<parallel>, #tpu.dimension_semantics<parallel>], iteration_bounds = array<i64: 2, 1>, scalar_prefetch = 0 : i64, scratch_operands = 0 : i64, tpu.core_type = #tpu.core_type<tc>, window_params = [{transform_indices = @transform_0, window_bounds = array<i64: 1, 4, 256>}, {pipeline_mode = #tpu.pipeline_mode<synchronous>, transform_indices = @transform_1, window_bounds = array<i64: 64, 4>}, {pipeline_mode = #tpu.pipeline_mode<synchronous>, transform_indices = @transform_2, window_bounds = array<i64: 64, 1>}, {transform_indices = @transform_3, window_bounds = array<i64: 1, 32, 256>}, {transform_indices = @transform_4, window_bounds = array<i64: 1, 32, 256>}]} {
    %c0 = arith.constant 0 : index
    %c0_0 = arith.constant 0 : index
    %0 = vector.load %arg3[%c0, %c0_0] : memref<64x4xf32, #tpu.memory_space<vmem>>, vector<64x4xf32>
    %c0_1 = arith.constant 0 : index
    %c0_2 = arith.constant 0 : index
    %c0_3 = arith.constant 0 : index
    %1 = vector.load %arg2[%c0_1, %c0_2, %c0_3] : memref<1x4x256xf32, #tpu.memory_space<vmem>>, vector<1x4x256xf32>
    %2 = vector.shape_cast %1 : vector<1x4x256xf32> to vector<4x256xf32>
    %cst = arith.constant dense<0.000000e+00> : vector<64x256xf32>
    %3 = tpu.matmul %0, %2, %cst {dimension_numbers = #tpu.dot_dimension_numbers<[1], [0], [0], [1], [0, 0, 1, 1], [], []>} : vector<64x4xf32>, vector<4x256xf32>, vector<64x256xf32> -> vector<64x256xf32>
    %c0_4 = arith.constant 0 : index
    %c0_5 = arith.constant 0 : index
    %4 = vector.load %arg4[%c0_4, %c0_5] : memref<64x1xf32, #tpu.memory_space<vmem>>, vector<64x1xf32>
    %5 = vector.broadcast %4 : vector<64x1xf32> to vector<64x256xf32>
    %6 = arith.addf %3, %5 : vector<64x256xf32>
    %7 = vector.extract_strided_slice %6 {offsets = [0, 0], sizes = [32, 256], strides = [1, 1]} : vector<64x256xf32> to vector<32x256xf32>
    %c0_6 = arith.constant 0 : index
    %c0_7 = arith.constant 0 : index
    %c0_8 = arith.constant 0 : index
    %8 = vector.load %arg5[%c0_6, %c0_7, %c0_8] : memref<1x32x256xf32, #tpu.memory_space<vmem>>, vector<1x32x256xf32>
    %9 = vector.shape_cast %8 : vector<1x32x256xf32> to vector<32x256xf32>
    %10 = vector.shape_cast %7 : vector<32x256xf32> to vector<1x32x256xf32>
    tpu.vector_store %arg5[%c0_6, %c0_7, %c0_8], %10 {strides = array<i32>} : memref<1x32x256xf32, #tpu.memory_space<vmem>>, vector<1x32x256xf32>,
    %11 = vector.extract_strided_slice %6 {offsets = [32, 0], sizes = [32, 256], strides = [1, 1]} : vector<64x256xf32> to vector<32x256xf32>
    %c0_9 = arith.constant 0 : index
    %c0_10 = arith.constant 0 : index
    %c0_11 = arith.constant 0 : index
    %12 = vector.load %arg6[%c0_9, %c0_10, %c0_11] : memref<1x32x256xf32, #tpu.memory_space<vmem>>, vector<1x32x256xf32>
    %13 = vector.shape_cast %12 : vector<1x32x256xf32> to vector<32x256xf32>
    %14 = vector.shape_cast %11 : vector<32x256xf32> to vector<1x32x256xf32>
    tpu.vector_store %arg6[%c0_9, %c0_10, %c0_11], %14 {strides = array<i32>} : memref<1x32x256xf32, #tpu.memory_space<vmem>>, vector<1x32x256xf32>,
    return
  }
  func.func @transform_0(%arg0: i32, %arg1: i32) -> (i32, i32, i32) {
    %c0_i32 = arith.constant 0 : i32
    %c0_i32_0 = arith.constant 0 : i32
    return %arg0, %c0_i32, %arg1 : i32, i32, i32
  }
  func.func @transform_1(%arg0: i32, %arg1: i32) -> (i32, i32) {
    %c0_i32 = arith.constant 0 : i32
    %c0_i32_0 = arith.constant 0 : i32
    %c0_i32_1 = arith.constant 0 : i32
    return %c0_i32, %c0_i32_0 : i32, i32
  }
  func.func @transform_2(%arg0: i32, %arg1: i32) -> (i32, i32) {
    %c0_i32 = arith.constant 0 : i32
    %c0_i32_0 = arith.constant 0 : i32
    %c0_i32_1 = arith.constant 0 : i32
    return %c0_i32, %c0_i32_0 : i32, i32
  }
  func.func @transform_3(%arg0: i32, %arg1: i32) -> (i32, i32, i32) {
    %c0_i32 = arith.constant 0 : i32
    %c0_i32_0 = arith.constant 0 : i32
    return %arg0, %c0_i32, %arg1 : i32, i32, i32
  }
  func.func @transform_4(%arg0: i32, %arg1: i32) -> (i32, i32, i32) {
    %c0_i32 = arith.constant 0 : i32
    %c0_i32_0 = arith.constant 0 : i32
    return %arg0, %c0_i32, %arg1 : i32, i32, i32
  }
}

</mosaic_0001>

<bundles_post_ra>
// kernel: stage2_wrapper_forward.1
= control target key start
LH: loop header
LB: loop body
LE: loop exit
PB: predicated region body
PF: predicated region fallthrough
CT: control target
= control target key end

     0   :  { %s724_s15 = smov 0   ;;  %s726_s16 = smov 0   ;;  %s840_s0 = inlined_call_operand.vmem [shape: f32[2,4,256], index: 0, kind: input, shape index: {}]   ;;  %s841_s1 = inlined_call_operand.vmem [shape: f32[64,4], index: 1, kind: input, shape index: {}]   ;;  %s842_s2 = inlined_call_operand.vmem [shape: f32[64,1], index: 2, kind: input, shape index: {}]   ;;  %s843_s3 = inlined_call_operand.vmem [shape: f32[2,32,256], index: 3, kind: output, shape index: {0}]   ;;  %s844_s4 = inlined_call_operand.vmem [shape: f32[2,32,256], index: 4, kind: output, shape index: {1}]  }
   0x1   :  { %s728_s17 = smov 0  }
   0x2 LB: > { %s27_s18 = sadd.s32 1, %s691_s16  ;;  %p620_p0 = scmp.ge.s32.totalorder %s695_s17, 1  ;;  %s695_s17 = sphi %s728_s17, %s15_s17   ;;  %s691_s16 = sphi %s726_s16, %s846_s16   ;;  %s687_s15 = sphi %s724_s15, %s845_s15  }
   0x3   : > { %p29_p1 = scmp.ge.s32.totalorder %s27_s18, 2  ;;  %p188_p2 = scmp.lt.s32.totalorder %s695_s17, 3 }
   0x5   : > { %s848_s18 = smov (%p29_p1, %s27_s18), 0  ;;  %p189_p3 = pnand %p620_p0, %p188_p2 }
   0x6   : > { %p232_p4 = scmp.lt.s32.totalorder (!%p189_p3), %s687_s15, 1  ;;  %v697_v0 = vmov (!%p189_p3), 0.0   ;;  %v698_v1 = vmov (!%p189_p3), 0   ;;  %v272_v2 = vld [vmem:[%s842_s2 + $0x10] sm:$0xff] (!%p189_p3)  ;;  %v270_v3 = vld [vmem:[%s842_s2] sm:$0xff] (!%p189_p3)  ;;  %v273_v4 = vld [vmem:[%s842_s2 + $0x18] sm:$0xff] (!%p189_p3) }
   0x7   : > { %192 = sbr.rel (%p189_p3) target bundleno = 250 (0xfa), region = 32  ;;  %414 = vmatprep.mubr.f32.mxu0 (!%p189_p3), %v697_v0  ;;  %438 = vmatprep.mubr.f32.mxu1 (!%p189_p3), %v697_v0  ;;  %v271_v5 = vld [vmem:[%s842_s2 + $0x8] sm:$0xff] (!%p189_p3)  ;;  %vm345_vm0 = vcmask (!%p189_p3), 1043456   ;;  %v261_v8 = vld [vmem:[%s841_s1] sm:$0xff] (!%p189_p3)  ;;  %vm320_vm1 = vcmask (!%p189_p3), 31744   ;;  %v277_v14 = vld [vmem:[%s842_s2 + $0x38] sm:$0xff] (!%p189_p3) }
   0x8   : > { %671 = vset.pattern.permute.xlu1 (!%p189_p3), %v698_v1  ;;  %670 = vset.pattern.permute.xlu0 (!%p189_p3), %v698_v1  ;;  %v265_v9 = vld [vmem:[%s841_s1 + $0x20] sm:$0xff] (!%p189_p3)  ;;  %v275_v10 = vld [vmem:[%s842_s2 + $0x28] sm:$0xff] (!%p189_p3)  ;;  %v276_v15 = vld [vmem:[%s842_s2 + $0x30] sm:$0xff] (!%p189_p3) }
   0x9   : > { %290 = vperm.xlu1 (!%p189_p3), %671, %v272_v2   ;;  %280 = vperm.xlu0 (!%p189_p3), %670, %v270_v3   ;;  %v274_v11 = vld [vmem:[%s842_s2 + $0x20] sm:$0xff] (!%p189_p3)  ;;  %v262_v12 = vld [vmem:[%s841_s1 + $0x8] sm:$0xff] (!%p189_p3)  ;;  %v263_v16 = vld [vmem:[%s841_s1 + $0x10] sm:$0xff] (!%p189_p3) }
   0xa   : > { %v266_v13 = vld [vmem:[%s841_s1 + $0x28] sm:$0xff] (!%p189_p3)  ;;  %v267_v17 = vld [vmem:[%s841_s1 + $0x30] sm:$0xff] (!%p189_p3)  ;;  %v264_v18 = vld [vmem:[%s841_s1 + $0x18] sm:$0xff] (!%p189_p3) }
   0xb   : > { %v268_v19 = vld [vmem:[%s841_s1 + $0x38] sm:$0xff] (!%p189_p3) }
   0xd   : > { %295 = vperm.xlu1 (!%p189_p3), %671, %v273_v4   ;;  %285 = vperm.xlu0 (!%p189_p3), %670, %v271_v5  }
   0xe   : > { %s850_s15 = smov (!%p232_p4, %s687_s15), 1 }
   0xf   : > { %s639_s23 = sshll.u32 %s850_s15, 3  ;;  %s640_s7 = sshll.u32 %s850_s15, 6 }
  0x10   : > { %s239_s26 = scalar_lea.vmem %s840_s0, %s639_s23  ;;  %s808_s10 = scalar_lea.vmem %s843_s3, %s640_s7 }
  0x11   : > { %v269_v6 = vld [vmem:[%s239_s26] sm:$0xff]  ;;  %305 = vperm.xlu1 %671, %v275_v10   ;;  %300 = vperm.xlu0 %670, %v274_v11   ;;  %s813_s13 = scalar_lea.vmem %s844_s4, %s640_s7 }
  0x12   : > { %v319_v7 = vcombine.high %v269_v6, %v269_v6 }
  0x14   : > { %627 = vmatprep.subr.msk.mxu0 %vm345_vm0, %v319_v7  ;;  %642 = vmatprep.subr.msk.mxu1 %vm345_vm0, %v319_v7 }
  0x15   : > { %628 = vmatpush1.msk.msra.mxu0 %vm345_vm0, %v269_v6  ;;  %643 = vmatpush1.msk.msra.mxu1 %vm345_vm0, %v269_v6 }
  0x16   : > { %629 = vmatmul.mubr.msk.f32.vlgmr.msra.gmra.mrb[0].mxu0 %vm320_vm1, %v261_v8  ;;  %633 = vmatmul.mubr.msk.f32.vlgmr.msra.gmra.mrb[0].mxu1 %vm320_vm1, %v265_v9 }
  0x17   : > { %420 = vmatprep.mubr.f32.mxu0 %v697_v0  ;;  %444 = vmatprep.mubr.f32.mxu1 %v697_v0 }
  0x18   : > { %315 = vperm.xlu1 %671, %v277_v14   ;;  %310 = vperm.xlu0 %670, %v276_v15  }
  0x1a   : > { %630 = vmatmul.mubr.msk.f32.gmra.mrb[2].mxu0 %vm320_vm1, %v262_v12  ;;  %634 = vmatmul.mubr.msk.f32.gmra.mrb[2].mxu1 %vm320_vm1, %v266_v13 }
  0x1b   : > { %426 = vmatprep.mubr.f32.mxu0 %v697_v0  ;;  %450 = vmatprep.mubr.f32.mxu1 %v697_v0 }
  0x1e   : > { %631 = vmatmul.mubr.msk.f32.gmra.mrb[4].mxu0 %vm320_vm1, %v263_v16  ;;  %635 = vmatmul.mubr.msk.f32.gmra.mrb[4].mxu1 %vm320_vm1, %v267_v17 }
  0x1f   : > { %432 = vmatprep.mubr.f32.mxu0 %v697_v0  ;;  %456 = vmatprep.mubr.f32.mxu1 %v697_v0 }
  0x22   : > { %632 = vmatmul.mubr.msk.f32.gmra.mrb[6].mxu0 %vm320_vm1, %v264_v18  ;;  %636 = vmatmul.mubr.msk.f32.gmra.mrb[6].mxu1 %vm320_vm1, %v268_v19 }
  0x88   : > { %v281_v20 = vpop.permute.xlu0 %280  ;;  %v291_v21 = vpop.permute.xlu1 %290 }
  0x8c   : > { %v286_v22 = vpop.permute.xlu0 %285  ;;  %v296_v23 = vpop.permute.xlu1 %295 }
  0x90   : > { %v301_v24 = vpop.permute.xlu0 %300  ;;  %v306_v33 = vpop.permute.xlu1 %305 }
  0x97   : > { %v311_v42 = vpop.permute.xlu0 %310  ;;  %v316_v51 = vpop.permute.xlu1 %315 }
  0xe9   : > { %v416_v25 = vpop.f32.mrb[0].mxu0  ;;  %v440_v26 = vpop.f32.mrb[0].mxu1 }
  0xea   : > { %v417_v27 = vadd.f32 %v416_v25, %v281_v20  ;;  %v441_v28 = vadd.f32 %v440_v26, %v301_v24  ;;  %v418_v29 = vpop.f32.mrb[1].mxu0  ;;  %v442_v30 = vpop.f32.mrb[1].mxu1 }
  0xeb   : > { %v419_v31 = vadd.f32 %v418_v29, %v281_v20  ;;  %v443_v32 = vadd.f32 %v442_v30, %v301_v24 }
  0xec   : > { %463 = vst [vmem:[%s808_s10] sm:$0xff] %v417_v27  ;;  %471 = vst [vmem:[%s813_s13] sm:$0xff] %v441_v28 }
  0xed   : > { %464 = vst [vmem:[%s808_s10 + $0x8] sm:$0xff] %v419_v31  ;;  %472 = vst [vmem:[%s813_s13 + $0x8] sm:$0xff] %v443_v32  ;;  %v422_v34 = vpop.f32.mrb[2].mxu0  ;;  %v446_v35 = vpop.f32.mrb[2].mxu1 }
  0xee   : > { %v423_v36 = vadd.f32 %v422_v34, %v286_v22  ;;  %v447_v37 = vadd.f32 %v446_v35, %v306_v33  ;;  %v424_v38 = vpop.f32.mrb[3].mxu0  ;;  %v448_v39 = vpop.f32.mrb[3].mxu1 }
  0xef   : > { %v425_v40 = vadd.f32 %v424_v38, %v286_v22  ;;  %v449_v41 = vadd.f32 %v448_v39, %v306_v33 }
  0xf0   : > { %465 = vst [vmem:[%s808_s10 + $0x10] sm:$0xff] %v423_v36  ;;  %473 = vst [vmem:[%s813_s13 + $0x10] sm:$0xff] %v447_v37 }
  0xf1   : > { %466 = vst [vmem:[%s808_s10 + $0x18] sm:$0xff] %v425_v40  ;;  %474 = vst [vmem:[%s813_s13 + $0x18] sm:$0xff] %v449_v41  ;;  %v428_v43 = vpop.f32.mrb[4].mxu0  ;;  %v452_v44 = vpop.f32.mrb[4].mxu1 }
  0xf2   : > { %v429_v45 = vadd.f32 %v428_v43, %v291_v21  ;;  %v453_v46 = vadd.f32 %v452_v44, %v311_v42  ;;  %v430_v47 = vpop.f32.mrb[5].mxu0  ;;  %v454_v48 = vpop.f32.mrb[5].mxu1 }
  0xf3   : > { %v431_v49 = vadd.f32 %v430_v47, %v291_v21  ;;  %v455_v50 = vadd.f32 %v454_v48, %v311_v42 }
  0xf4   : > { %467 = vst [vmem:[%s808_s10 + $0x20] sm:$0xff] %v429_v45  ;;  %475 = vst [vmem:[%s813_s13 + $0x20] sm:$0xff] %v453_v46 }
  0xf5   : > { %468 = vst [vmem:[%s808_s10 + $0x28] sm:$0xff] %v431_v49  ;;  %476 = vst [vmem:[%s813_s13 + $0x28] sm:$0xff] %v455_v50  ;;  %v434_v52 = vpop.f32.mrb[6].mxu0  ;;  %v458_v53 = vpop.f32.mrb[6].mxu1 }
  0xf6   : > { %v435_v54 = vadd.f32 %v434_v52, %v296_v23  ;;  %v459_v55 = vadd.f32 %v458_v53, %v316_v51  ;;  %v436_v56 = vpop.f32.mrb[7].mxu0  ;;  %v460_v57 = vpop.f32.mrb[7].mxu1 }
  0xf7   : > { %v437_v58 = vadd.f32 %v436_v56, %v296_v23  ;;  %v461_v59 = vadd.f32 %v460_v57, %v316_v51 }
  0xf8   : > { %469 = vst [vmem:[%s808_s10 + $0x30] sm:$0xff] %v435_v54  ;;  %477 = vst [vmem:[%s813_s13 + $0x30] sm:$0xff] %v459_v55 }
  0xf9   : > { %470 = vst [vmem:[%s808_s10 + $0x38] sm:$0xff] %v437_v58  ;;  %478 = vst [vmem:[%s813_s13 + $0x38] sm:$0xff] %v461_v59 }
  0xfa PF: > { %s15_s17 = sadd.s32 1, %s695_s17   ;;  %s845_s15 = smov %s691_s16 }
  0xfb   : > { %p12_p5 = scmp.ge.s32.totalorder %s15_s17, 4   ;;  %s846_s16 = smov %s848_s18 }
  0xfd   :  { %14 = sbr.rel (!%p12_p5) target bundleno = 2 (0x2), region = 74 }

</bundles_post_ra>
